<compile_context>
chip_gen: v6e
topology: v6e:2x2x1
jax: 0.10.0
libtpu: 0.0.40
codegen_flags: <defaults>
</compile_context>

<pallas_src>
import jax
import jax.numpy as jnp
from jax.experimental import pallas as pl
from jax.experimental.pallas import tpu as pltpu


def _lstm_kernel(onehot_ref, table_ref, wh_ref, wph_ref, bp_ref, out_ref):
    """Whole-sequence LSTM + classifier head, fully resident in VMEM."""
    hidden = wh_ref.shape[0]            # H
    batch = out_ref.shape[0]            # B
    total = onehot_ref.shape[0]         # seq_len * B
    seq_len = total // batch

    # ---- x path (no recurrence dependence): one tiny matmul ----
    # onehot: (T*B, V) time-major rows; table: (V, 4H) with bias folded in.
    xw = jnp.dot(onehot_ref[...], table_ref[...],
                 preferred_element_type=jnp.float32)            # (T*B, 4H)

    wh = wh_ref[...]                                            # (H, 4H)

    h = jnp.zeros((batch, hidden), jnp.float32)
    c = jnp.zeros((batch, hidden), jnp.float32)

    # Fully-unrolled recurrence; xw row slices are (8,128)-tile aligned
    # (batch == 8) so each slice is a plain vreg pick.  Gate order: [g,i,f,o].
    for t in range(seq_len):
        pre = xw[t * batch:(t + 1) * batch, :] + jnp.dot(
            h, wh, preferred_element_type=jnp.float32)          # (B, 4H)
        g = jnp.tanh(pre[:, :hidden])                           # H-wide tanh
        sig = jax.nn.sigmoid(pre[:, hidden:])                   # 3H-wide sigmoid
        i = sig[:, :hidden]
        f = sig[:, hidden:2 * hidden]
        o = sig[:, 2 * hidden:]
        c = g * i + c * f
        h = jnp.tanh(c) * o

    # ---- classifier head + LogSoftmax(dim=1) ----
    p = (jnp.dot(h, wph_ref[...], preferred_element_type=jnp.float32)
         + bp_ref[...])                                         # (B, C)
    m = jnp.max(p, axis=1, keepdims=True)
    lse = m + jnp.log(jnp.sum(jnp.exp(p - m), axis=1, keepdims=True))
    out_ref[...] = p - lse


def fuse_params(params):
    """One-time (off the per-call path) fusion of parameters.

    Gate order along the 4H axis is [g, i, f, o]; the embedding, the x-path
    weights and the gate biases are folded into a single (vocab, 4H) table so
    the kernel's x path is one one-hot matmul.
    """
    wx = jnp.concatenate([params["W_gx"], params["W_ix"],
                          params["W_fx"], params["W_ox"]], axis=1)   # (D, 4H)
    wh = jnp.concatenate([params["W_gh"], params["W_ih"],
                          params["W_fh"], params["W_oh"]], axis=1)   # (H, 4H)
    b = jnp.concatenate([params["b_g"], params["b_i"],
                         params["b_f"], params["b_o"]], axis=1)      # (1, 4H)
    table = params["embedding"].astype(jnp.float32) @ wx + b         # (V, 4H)
    fused = {
        "table": table,
        "wh": wh.astype(jnp.float32),
        "wph": params["W_ph"].astype(jnp.float32),
        "bp": params["b_p"].astype(jnp.float32),
    }
    return jax.tree_util.tree_map(jax.block_until_ready, fused)


@jax.jit
def lstm_forward(tokens, fused):
    """tokens: (batch, seq, 1) int32 in {0..V-1}.  fused: dict from fuse_params."""
    batch, seq_len, _ = tokens.shape
    vocab = fused["table"].shape[0]
    num_classes = fused["wph"].shape[1]

    # Per-call token handling only: flatten time-major and build the tiny
    # (T*B, V) f32 one-hot here so the kernel critical path starts at the
    # x-path matmul.  Row r <-> (t = r // batch, b = r % batch).
    tok_tm = jnp.transpose(tokens[..., 0], (1, 0)).reshape(seq_len * batch)
    onehot = jax.nn.one_hot(tok_tm, vocab, dtype=jnp.float32)

    vmem = pl.BlockSpec(memory_space=pltpu.MemorySpace.VMEM)
    return pl.pallas_call(
        _lstm_kernel,
        out_shape=jax.ShapeDtypeStruct((batch, num_classes), jnp.float32),
        in_specs=[vmem] * 5,
        out_specs=vmem,
    )(onehot, fused["table"], fused["wh"], fused["wph"], fused["bp"])


def init_params(key, input_dim, hidden_dim, num_classes):
    """Deterministic kaiming-normal-style init matching the PyTorch shapes."""
    keys = jax.random.split(key, 16)
    kidx = iter(range(16))

    def kaiming(k, shape):
        fan = shape[1]
        std = (2.0 / fan) ** 0.5
        return std * jax.random.normal(k, shape, jnp.float32)

    p = {}
    for gate in ("g", "i", "f", "o"):
        p[f"W_{gate}x"] = kaiming(keys[next(kidx)], (input_dim, hidden_dim))
        p[f"W_{gate}h"] = kaiming(keys[next(kidx)], (hidden_dim, hidden_dim))
        p[f"b_{gate}"] = jnp.zeros((1, hidden_dim), jnp.float32)
    p["W_ph"] = kaiming(keys[next(kidx)], (hidden_dim, num_classes))
    p["b_p"] = jnp.zeros((1, num_classes), jnp.float32)
    # nn.Embedding default init: N(0, 1)
    p["embedding"] = jax.random.normal(keys[next(kidx)], (3, input_dim),
                                       jnp.float32)
    return p


def lstm_reference(tokens, params):
    """Pure-JAX reference of the PyTorch forward for a sanity check."""
    x = params["embedding"][tokens[..., 0]].astype(jnp.float32)  # (B, T, D)
    B, T, _ = x.shape
    H = params["W_gh"].shape[0]
    h = jnp.zeros((B, H), jnp.float32)
    c = jnp.zeros((B, H), jnp.float32)
    for t in range(T):
        xt = x[:, t, :]
        g = jnp.tanh(xt @ params["W_gx"] + h @ params["W_gh"] + params["b_g"])
        i = jax.nn.sigmoid(xt @ params["W_ix"] + h @ params["W_ih"] + params["b_i"])
        f = jax.nn.sigmoid(xt @ params["W_fx"] + h @ params["W_fh"] + params["b_f"])
        o = jax.nn.sigmoid(xt @ params["W_ox"] + h @ params["W_oh"] + params["b_o"])
        c = g * i + c * f
        h = jnp.tanh(c) * o
    p = h @ params["W_ph"] + params["b_p"]
    return jax.nn.log_softmax(p, axis=1)


if __name__ == "__main__":
    seq_length = 8
    input_dim = 16
    hidden_dim = 32
    num_classes = 10
    batch_size = 8

    key = jax.random.PRNGKey(0)
    k_param, k_tok = jax.random.split(key)
    params = init_params(k_param, input_dim, hidden_dim, num_classes)

    # One-time parameter fusion — off the per-call path.
    fused = fuse_params(params)

    # integer tokens in {0, 1, 2} — matches nn.Embedding(num_embeddings=3, ...)
    tokens = jax.random.randint(k_tok, (batch_size, seq_length, 1), 0, 3,
                                jnp.int32)

    y_hat = jax.block_until_ready(lstm_forward(tokens, fused))

    y_ref = lstm_reference(tokens, params)
    assert y_hat.shape == (batch_size, num_classes)
    assert jnp.allclose(y_hat, y_ref, atol=1e-4, rtol=1e-4), \
        "mismatch vs reference"

    print("KERNEL_OK")
</pallas_src>

<mosaic_0001>
module attributes {stable_mosaic.version = 11 : i64} {
  func.func @_lstm_kernel(%arg0: memref<64x3xf32, #tpu.memory_space<vmem>>, %arg1: memref<3x128xf32, #tpu.memory_space<vmem>>, %arg2: memref<32x128xf32, #tpu.memory_space<vmem>>, %arg3: memref<32x10xf32, #tpu.memory_space<vmem>>, %arg4: memref<1x10xf32, #tpu.memory_space<vmem>>, %arg5: memref<8x10xf32, #tpu.memory_space<vmem>>) attributes {dimension_semantics = [], scalar_prefetch = 0 : i64, scratch_operands = 0 : i64, tpu.core_type = #tpu.core_type<tc>} {
    %c0 = arith.constant 0 : index
    %c0_0 = arith.constant 0 : index
    %0 = vector.load %arg0[%c0, %c0_0] : memref<64x3xf32, #tpu.memory_space<vmem>>, vector<64x3xf32>
    %c0_1 = arith.constant 0 : index
    %c0_2 = arith.constant 0 : index
    %1 = vector.load %arg1[%c0_1, %c0_2] : memref<3x128xf32, #tpu.memory_space<vmem>>, vector<3x128xf32>
    %cst = arith.constant dense<0.000000e+00> : vector<64x128xf32>
    %2 = tpu.matmul %0, %1, %cst {dimension_numbers = #tpu.dot_dimension_numbers<[1], [0], [0], [1], [0, 0, 1, 1], [], []>} : vector<64x3xf32>, vector<3x128xf32>, vector<64x128xf32> -> vector<64x128xf32>
    %c0_3 = arith.constant 0 : index
    %c0_4 = arith.constant 0 : index
    %3 = vector.load %arg2[%c0_3, %c0_4] : memref<32x128xf32, #tpu.memory_space<vmem>>, vector<32x128xf32>
    %cst_5 = arith.constant 0.000000e+00 : f32
    %4 = vector.broadcast %cst_5 : f32 to vector<8x32xf32>
    %cst_6 = arith.constant 0.000000e+00 : f32
    %5 = vector.broadcast %cst_6 : f32 to vector<8x32xf32>
    %6 = vector.extract_strided_slice %2 {offsets = [0, 0], sizes = [8, 128], strides = [1, 1]} : vector<64x128xf32> to vector<8x128xf32>
    %cst_7 = arith.constant dense<0.000000e+00> : vector<8x128xf32>
    %7 = tpu.matmul %4, %3, %cst_7 {dimension_numbers = #tpu.dot_dimension_numbers<[1], [0], [0], [1], [0, 0, 1, 1], [], []>} : vector<8x32xf32>, vector<32x128xf32>, vector<8x128xf32> -> vector<8x128xf32>
    %8 = arith.addf %6, %7 : vector<8x128xf32>
    %9 = vector.extract_strided_slice %8 {offsets = [0, 0], sizes = [8, 32], strides = [1, 1]} : vector<8x128xf32> to vector<8x32xf32>
    %10 = math.tanh %9 : vector<8x32xf32>
    %11 = vector.extract_strided_slice %8 {offsets = [0, 32], sizes = [8, 96], strides = [1, 1]} : vector<8x128xf32> to vector<8x96xf32>
    %12 = arith.negf %11 : vector<8x96xf32>
    %13 = math.exp %12 : vector<8x96xf32>
    %cst_8 = arith.constant 1.000000e+00 : f32
    %14 = vector.broadcast %cst_8 : f32 to vector<8x96xf32>
    %15 = arith.addf %14, %13 : vector<8x96xf32>
    %16 = arith.divf %14, %15 : vector<8x96xf32>
    %17 = vector.extract_strided_slice %16 {offsets = [0, 0], sizes = [8, 32], strides = [1, 1]} : vector<8x96xf32> to vector<8x32xf32>
    %18 = vector.extract_strided_slice %16 {offsets = [0, 32], sizes = [8, 32], strides = [1, 1]} : vector<8x96xf32> to vector<8x32xf32>
    %19 = vector.extract_strided_slice %16 {offsets = [0, 64], sizes = [8, 32], strides = [1, 1]} : vector<8x96xf32> to vector<8x32xf32>
    %20 = arith.mulf %10, %17 : vector<8x32xf32>
    %21 = arith.mulf %5, %18 : vector<8x32xf32>
    %22 = arith.addf %20, %21 : vector<8x32xf32>
    %23 = math.tanh %22 : vector<8x32xf32>
    %24 = arith.mulf %23, %19 : vector<8x32xf32>
    %25 = vector.extract_strided_slice %2 {offsets = [8, 0], sizes = [8, 128], strides = [1, 1]} : vector<64x128xf32> to vector<8x128xf32>
    %cst_9 = arith.constant dense<0.000000e+00> : vector<8x128xf32>
    %26 = tpu.matmul %24, %3, %cst_9 {dimension_numbers = #tpu.dot_dimension_numbers<[1], [0], [0], [1], [0, 0, 1, 1], [], []>} : vector<8x32xf32>, vector<32x128xf32>, vector<8x128xf32> -> vector<8x128xf32>
    %27 = arith.addf %25, %26 : vector<8x128xf32>
    %28 = vector.extract_strided_slice %27 {offsets = [0, 0], sizes = [8, 32], strides = [1, 1]} : vector<8x128xf32> to vector<8x32xf32>
    %29 = math.tanh %28 : vector<8x32xf32>
    %30 = vector.extract_strided_slice %27 {offsets = [0, 32], sizes = [8, 96], strides = [1, 1]} : vector<8x128xf32> to vector<8x96xf32>
    %31 = arith.negf %30 : vector<8x96xf32>
    %32 = math.exp %31 : vector<8x96xf32>
    %cst_10 = arith.constant 1.000000e+00 : f32
    %33 = vector.broadcast %cst_10 : f32 to vector<8x96xf32>
    %34 = arith.addf %33, %32 : vector<8x96xf32>
    %35 = arith.divf %33, %34 : vector<8x96xf32>
    %36 = vector.extract_strided_slice %35 {offsets = [0, 0], sizes = [8, 32], strides = [1, 1]} : vector<8x96xf32> to vector<8x32xf32>
    %37 = vector.extract_strided_slice %35 {offsets = [0, 32], sizes = [8, 32], strides = [1, 1]} : vector<8x96xf32> to vector<8x32xf32>
    %38 = vector.extract_strided_slice %35 {offsets = [0, 64], sizes = [8, 32], strides = [1, 1]} : vector<8x96xf32> to vector<8x32xf32>
    %39 = arith.mulf %29, %36 : vector<8x32xf32>
    %40 = arith.mulf %22, %37 : vector<8x32xf32>
    %41 = arith.addf %39, %40 : vector<8x32xf32>
    %42 = math.tanh %41 : vector<8x32xf32>
    %43 = arith.mulf %42, %38 : vector<8x32xf32>
    %44 = vector.extract_strided_slice %2 {offsets = [16, 0], sizes = [8, 128], strides = [1, 1]} : vector<64x128xf32> to vector<8x128xf32>
    %cst_11 = arith.constant dense<0.000000e+00> : vector<8x128xf32>
    %45 = tpu.matmul %43, %3, %cst_11 {dimension_numbers = #tpu.dot_dimension_numbers<[1], [0], [0], [1], [0, 0, 1, 1], [], []>} : vector<8x32xf32>, vector<32x128xf32>, vector<8x128xf32> -> vector<8x128xf32>
    %46 = arith.addf %44, %45 : vector<8x128xf32>
    %47 = vector.extract_strided_slice %46 {offsets = [0, 0], sizes = [8, 32], strides = [1, 1]} : vector<8x128xf32> to vector<8x32xf32>
    %48 = math.tanh %47 : vector<8x32xf32>
    %49 = vector.extract_strided_slice %46 {offsets = [0, 32], sizes = [8, 96], strides = [1, 1]} : vector<8x128xf32> to vector<8x96xf32>
    %50 = arith.negf %49 : vector<8x96xf32>
    %51 = math.exp %50 : vector<8x96xf32>
    %cst_12 = arith.constant 1.000000e+00 : f32
    %52 = vector.broadcast %cst_12 : f32 to vector<8x96xf32>
    %53 = arith.addf %52, %51 : vector<8x96xf32>
    %54 = arith.divf %52, %53 : vector<8x96xf32>
    %55 = vector.extract_strided_slice %54 {offsets = [0, 0], sizes = [8, 32], strides = [1, 1]} : vector<8x96xf32> to vector<8x32xf32>
    %56 = vector.extract_strided_slice %54 {offsets = [0, 32], sizes = [8, 32], strides = [1, 1]} : vector<8x96xf32> to vector<8x32xf32>
    %57 = vector.extract_strided_slice %54 {offsets = [0, 64], sizes = [8, 32], strides = [1, 1]} : vector<8x96xf32> to vector<8x32xf32>
    %58 = arith.mulf %48, %55 : vector<8x32xf32>
    %59 = arith.mulf %41, %56 : vector<8x32xf32>
    %60 = arith.addf %58, %59 : vector<8x32xf32>
    %61 = math.tanh %60 : vector<8x32xf32>
    %62 = arith.mulf %61, %57 : vector<8x32xf32>
    %63 = vector.extract_strided_slice %2 {offsets = [24, 0], sizes = [8, 128], strides = [1, 1]} : vector<64x128xf32> to vector<8x128xf32>
    %cst_13 = arith.constant dense<0.000000e+00> : vector<8x128xf32>
    %64 = tpu.matmul %62, %3, %cst_13 {dimension_numbers = #tpu.dot_dimension_numbers<[1], [0], [0], [1], [0, 0, 1, 1], [], []>} : vector<8x32xf32>, vector<32x128xf32>, vector<8x128xf32> -> vector<8x128xf32>
    %65 = arith.addf %63, %64 : vector<8x128xf32>
    %66 = vector.extract_strided_slice %65 {offsets = [0, 0], sizes = [8, 32], strides = [1, 1]} : vector<8x128xf32> to vector<8x32xf32>
    %67 = math.tanh %66 : vector<8x32xf32>
    %68 = vector.extract_strided_slice %65 {offsets = [0, 32], sizes = [8, 96], strides = [1, 1]} : vector<8x128xf32> to vector<8x96xf32>
    %69 = arith.negf %68 : vector<8x96xf32>
    %70 = math.exp %69 : vector<8x96xf32>
    %cst_14 = arith.constant 1.000000e+00 : f32
    %71 = vector.broadcast %cst_14 : f32 to vector<8x96xf32>
    %72 = arith.addf %71, %70 : vector<8x96xf32>
    %73 = arith.divf %71, %72 : vector<8x96xf32>
    %74 = vector.extract_strided_slice %73 {offsets = [0, 0], sizes = [8, 32], strides = [1, 1]} : vector<8x96xf32> to vector<8x32xf32>
    %75 = vector.extract_strided_slice %73 {offsets = [0, 32], sizes = [8, 32], strides = [1, 1]} : vector<8x96xf32> to vector<8x32xf32>
    %76 = vector.extract_strided_slice %73 {offsets = [0, 64], sizes = [8, 32], strides = [1, 1]} : vector<8x96xf32> to vector<8x32xf32>
    %77 = arith.mulf %67, %74 : vector<8x32xf32>
    %78 = arith.mulf %60, %75 : vector<8x32xf32>
    %79 = arith.addf %77, %78 : vector<8x32xf32>
    %80 = math.tanh %79 : vector<8x32xf32>
    %81 = arith.mulf %80, %76 : vector<8x32xf32>
    %82 = vector.extract_strided_slice %2 {offsets = [32, 0], sizes = [8, 128], strides = [1, 1]} : vector<64x128xf32> to vector<8x128xf32>
    %cst_15 = arith.constant dense<0.000000e+00> : vector<8x128xf32>
    %83 = tpu.matmul %81, %3, %cst_15 {dimension_numbers = #tpu.dot_dimension_numbers<[1], [0], [0], [1], [0, 0, 1, 1], [], []>} : vector<8x32xf32>, vector<32x128xf32>, vector<8x128xf32> -> vector<8x128xf32>
    %84 = arith.addf %82, %83 : vector<8x128xf32>
    %85 = vector.extract_strided_slice %84 {offsets = [0, 0], sizes = [8, 32], strides = [1, 1]} : vector<8x128xf32> to vector<8x32xf32>
    %86 = math.tanh %85 : vector<8x32xf32>
    %87 = vector.extract_strided_slice %84 {offsets = [0, 32], sizes = [8, 96], strides = [1, 1]} : vector<8x128xf32> to vector<8x96xf32>
    %88 = arith.negf %87 : vector<8x96xf32>
    %89 = math.exp %88 : vector<8x96xf32>
    %cst_16 = arith.constant 1.000000e+00 : f32
    %90 = vector.broadcast %cst_16 : f32 to vector<8x96xf32>
    %91 = arith.addf %90, %89 : vector<8x96xf32>
    %92 = arith.divf %90, %91 : vector<8x96xf32>
    %93 = vector.extract_strided_slice %92 {offsets = [0, 0], sizes = [8, 32], strides = [1, 1]} : vector<8x96xf32> to vector<8x32xf32>
    %94 = vector.extract_strided_slice %92 {offsets = [0, 32], sizes = [8, 32], strides = [1, 1]} : vector<8x96xf32> to vector<8x32xf32>
    %95 = vector.extract_strided_slice %92 {offsets = [0, 64], sizes = [8, 32], strides = [1, 1]} : vector<8x96xf32> to vector<8x32xf32>
    %96 = arith.mulf %86, %93 : vector<8x32xf32>
    %97 = arith.mulf %79, %94 : vector<8x32xf32>
    %98 = arith.addf %96, %97 : vector<8x32xf32>
    %99 = math.tanh %98 : vector<8x32xf32>
    %100 = arith.mulf %99, %95 : vector<8x32xf32>
    %101 = vector.extract_strided_slice %2 {offsets = [40, 0], sizes = [8, 128], strides = [1, 1]} : vector<64x128xf32> to vector<8x128xf32>
    %cst_17 = arith.constant dense<0.000000e+00> : vector<8x128xf32>
    %102 = tpu.matmul %100, %3, %cst_17 {dimension_numbers = #tpu.dot_dimension_numbers<[1], [0], [0], [1], [0, 0, 1, 1], [], []>} : vector<8x32xf32>, vector<32x128xf32>, vector<8x128xf32> -> vector<8x128xf32>
    %103 = arith.addf %101, %102 : vector<8x128xf32>
    %104 = vector.extract_strided_slice %103 {offsets = [0, 0], sizes = [8, 32], strides = [1, 1]} : vector<8x128xf32> to vector<8x32xf32>
    %105 = math.tanh %104 : vector<8x32xf32>
    %106 = vector.extract_strided_slice %103 {offsets = [0, 32], sizes = [8, 96], strides = [1, 1]} : vector<8x128xf32> to vector<8x96xf32>
    %107 = arith.negf %106 : vector<8x96xf32>
    %108 = math.exp %107 : vector<8x96xf32>
    %cst_18 = arith.constant 1.000000e+00 : f32
    %109 = vector.broadcast %cst_18 : f32 to vector<8x96xf32>
    %110 = arith.addf %109, %108 : vector<8x96xf32>
    %111 = arith.divf %109, %110 : vector<8x96xf32>
    %112 = vector.extract_strided_slice %111 {offsets = [0, 0], sizes = [8, 32], strides = [1, 1]} : vector<8x96xf32> to vector<8x32xf32>
    %113 = vector.extract_strided_slice %111 {offsets = [0, 32], sizes = [8, 32], strides = [1, 1]} : vector<8x96xf32> to vector<8x32xf32>
    %114 = vector.extract_strided_slice %111 {offsets = [0, 64], sizes = [8, 32], strides = [1, 1]} : vector<8x96xf32> to vector<8x32xf32>
    %115 = arith.mulf %105, %112 : vector<8x32xf32>
    %116 = arith.mulf %98, %113 : vector<8x32xf32>
    %117 = arith.addf %115, %116 : vector<8x32xf32>
    %118 = math.tanh %117 : vector<8x32xf32>
    %119 = arith.mulf %118, %114 : vector<8x32xf32>
    %120 = vector.extract_strided_slice %2 {offsets = [48, 0], sizes = [8, 128], strides = [1, 1]} : vector<64x128xf32> to vector<8x128xf32>
    %cst_19 = arith.constant dense<0.000000e+00> : vector<8x128xf32>
    %121 = tpu.matmul %119, %3, %cst_19 {dimension_numbers = #tpu.dot_dimension_numbers<[1], [0], [0], [1], [0, 0, 1, 1], [], []>} : vector<8x32xf32>, vector<32x128xf32>, vector<8x128xf32> -> vector<8x128xf32>
    %122 = arith.addf %120, %121 : vector<8x128xf32>
    %123 = vector.extract_strided_slice %122 {offsets = [0, 0], sizes = [8, 32], strides = [1, 1]} : vector<8x128xf32> to vector<8x32xf32>
    %124 = math.tanh %123 : vector<8x32xf32>
    %125 = vector.extract_strided_slice %122 {offsets = [0, 32], sizes = [8, 96], strides = [1, 1]} : vector<8x128xf32> to vector<8x96xf32>
    %126 = arith.negf %125 : vector<8x96xf32>
    %127 = math.exp %126 : vector<8x96xf32>
    %cst_20 = arith.constant 1.000000e+00 : f32
    %128 = vector.broadcast %cst_20 : f32 to vector<8x96xf32>
    %129 = arith.addf %128, %127 : vector<8x96xf32>
    %130 = arith.divf %128, %129 : vector<8x96xf32>
    %131 = vector.extract_strided_slice %130 {offsets = [0, 0], sizes = [8, 32], strides = [1, 1]} : vector<8x96xf32> to vector<8x32xf32>
    %132 = vector.extract_strided_slice %130 {offsets = [0, 32], sizes = [8, 32], strides = [1, 1]} : vector<8x96xf32> to vector<8x32xf32>
    %133 = vector.extract_strided_slice %130 {offsets = [0, 64], sizes = [8, 32], strides = [1, 1]} : vector<8x96xf32> to vector<8x32xf32>
    %134 = arith.mulf %124, %131 : vector<8x32xf32>
    %135 = arith.mulf %117, %132 : vector<8x32xf32>
    %136 = arith.addf %134, %135 : vector<8x32xf32>
    %137 = math.tanh %136 : vector<8x32xf32>
    %138 = arith.mulf %137, %133 : vector<8x32xf32>
    %139 = vector.extract_strided_slice %2 {offsets = [56, 0], sizes = [8, 128], strides = [1, 1]} : vector<64x128xf32> to vector<8x128xf32>
    %cst_21 = arith.constant dense<0.000000e+00> : vector<8x128xf32>
    %140 = tpu.matmul %138, %3, %cst_21 {dimension_numbers = #tpu.dot_dimension_numbers<[1], [0], [0], [1], [0, 0, 1, 1], [], []>} : vector<8x32xf32>, vector<32x128xf32>, vector<8x128xf32> -> vector<8x128xf32>
    %141 = arith.addf %139, %140 : vector<8x128xf32>
    %142 = vector.extract_strided_slice %141 {offsets = [0, 0], sizes = [8, 32], strides = [1, 1]} : vector<8x128xf32> to vector<8x32xf32>
    %143 = math.tanh %142 : vector<8x32xf32>
    %144 = vector.extract_strided_slice %141 {offsets = [0, 32], sizes = [8, 96], strides = [1, 1]} : vector<8x128xf32> to vector<8x96xf32>
    %145 = arith.negf %144 : vector<8x96xf32>
    %146 = math.exp %145 : vector<8x96xf32>
    %cst_22 = arith.constant 1.000000e+00 : f32
    %147 = vector.broadcast %cst_22 : f32 to vector<8x96xf32>
    %148 = arith.addf %147, %146 : vector<8x96xf32>
    %149 = arith.divf %147, %148 : vector<8x96xf32>
    %150 = vector.extract_strided_slice %149 {offsets = [0, 0], sizes = [8, 32], strides = [1, 1]} : vector<8x96xf32> to vector<8x32xf32>
    %151 = vector.extract_strided_slice %149 {offsets = [0, 32], sizes = [8, 32], strides = [1, 1]} : vector<8x96xf32> to vector<8x32xf32>
    %152 = vector.extract_strided_slice %149 {offsets = [0, 64], sizes = [8, 32], strides = [1, 1]} : vector<8x96xf32> to vector<8x32xf32>
    %153 = arith.mulf %143, %150 : vector<8x32xf32>
    %154 = arith.mulf %136, %151 : vector<8x32xf32>
    %155 = arith.addf %153, %154 : vector<8x32xf32>
    %156 = math.tanh %155 : vector<8x32xf32>
    %157 = arith.mulf %156, %152 : vector<8x32xf32>
    %c0_23 = arith.constant 0 : index
    %c0_24 = arith.constant 0 : index
    %158 = vector.load %arg3[%c0_23, %c0_24] : memref<32x10xf32, #tpu.memory_space<vmem>>, vector<32x10xf32>
    %cst_25 = arith.constant dense<0.000000e+00> : vector<8x10xf32>
    %159 = tpu.matmul %157, %158, %cst_25 {dimension_numbers = #tpu.dot_dimension_numbers<[1], [0], [0], [1], [0, 0, 1, 1], [], []>} : vector<8x32xf32>, vector<32x10xf32>, vector<8x10xf32> -> vector<8x10xf32>
    %c0_26 = arith.constant 0 : index
    %c0_27 = arith.constant 0 : index
    %160 = vector.load %arg4[%c0_26, %c0_27] : memref<1x10xf32, #tpu.memory_space<vmem>>, vector<1x10xf32>
    %161 = vector.broadcast %160 : vector<1x10xf32> to vector<8x10xf32>
    %162 = arith.addf %159, %161 : vector<8x10xf32>
    %cst_28 = arith.constant dense<0xFF800000> : vector<8xf32>
    %163 = vector.multi_reduction <maximumf>, %162, %cst_28 [1] : vector<8x10xf32> to vector<8xf32>
    %164 = vector.shape_cast %163 : vector<8xf32> to vector<8x1xf32>
    %165 = vector.broadcast %164 : vector<8x1xf32> to vector<8x10xf32>
    %166 = arith.subf %162, %165 : vector<8x10xf32>
    %167 = math.exp %166 : vector<8x10xf32>
    %cst_29 = arith.constant dense<0.000000e+00> : vector<8xf32>
    %168 = vector.multi_reduction <add>, %167, %cst_29 [1] : vector<8x10xf32> to vector<8xf32>
    %169 = vector.shape_cast %168 : vector<8xf32> to vector<8x1xf32>
    %170 = math.log %169 : vector<8x1xf32>
    %171 = arith.addf %164, %170 : vector<8x1xf32>
    %172 = vector.broadcast %171 : vector<8x1xf32> to vector<8x10xf32>
    %173 = arith.subf %162, %172 : vector<8x10xf32>
    %c0_30 = arith.constant 0 : index
    %c0_31 = arith.constant 0 : index
    %174 = vector.load %arg5[%c0_30, %c0_31] : memref<8x10xf32, #tpu.memory_space<vmem>>, vector<8x10xf32>
    tpu.vector_store %arg5[%c0_30, %c0_31], %173 {strides = array<i32>} : memref<8x10xf32, #tpu.memory_space<vmem>>, vector<8x10xf32>,
    return
  }
}

</mosaic_0001>

<bundles_post_ra>
// kernel: eq.1
= control target key start
LH: loop header
LB: loop body
LE: loop exit
PB: predicated region body
PF: predicated region fallthrough
CT: control target
= control target key end

     0   :  { %s69_s10 = smov 56   ;;  %s70_s11 = smov 40   ;;  %vm3_vm0 = vcmask 64512   ;;  %vm9_vm1 = vcmask 523712   ;;  %vm15_vm2 = vcmask 458112   ;;  %vm21_vm3 = vcmask 392512   ;;  %s113_s0 = inlined_call_operand.vmem [shape: s32[8,8], index: 0, kind: input, shape index: {}]   ;;  %s114_s1 = inlined_call_operand.vmem [shape: s32[64], index: 1, kind: output, shape index: {}]  }
   0x1   :  { %v55_v0 = vld [vmem:[%s113_s0 + $0x7] sm:$0x1]   ;;  %v57_v1 = vld [vmem:[%s113_s0 + $0x5] sm:$0x1]   ;;  %v56_v2 = vld [vmem:[%s113_s0 + $0x6] sm:$0x1]  }
   0x2   :  { %7 = vrot.lane.b32.xlu0 %v55_v0, %s69_s10  ;;  %19 = vrot.lane.b32.xlu1 %v57_v1, %s70_s11  ;;  %v58_v3 = vld [vmem:[%s113_s0 + $0x4] sm:$0x1]   ;;  %v2_v4 = vld [vmem:[%s113_s0] sm:$0x1]   ;;  %s71_s18 = smov 48   ;;  %s72_s19 = smov 32  }
   0x3   :  { %4 = vst.msk [vmem:[#allocation0] sm:$0x1] %vm3_vm0, %v2_v4   ;;  %v59_v5 = vld [vmem:[%s113_s0 + $0x3] sm:$0x1]   ;;  %v60_v6 = vld [vmem:[%s113_s0 + $0x2] sm:$0x1]  }
   0x4   :  { %s73_s24 = smov 24   ;;  %s74_s25 = smov 16   ;;  %v61_v7 = vld [vmem:[%s113_s0 + $0x1] sm:$0x1]   ;;  %vm27_vm4 = vcmask 326912   ;;  %vm33_vm5 = vcmask 261312  }
   0x5   :  { %s75_s0 = smov 8   ;;  %vm39_vm6 = vcmask 195712   ;;  %vm45_vm7 = vcmask 130112  }
   0x6   :  { %13 = vrot.lane.b32.xlu0 %v56_v2, %s71_s18  ;;  %25 = vrot.lane.b32.xlu1 %v58_v3, %s72_s19 }
   0xa   :  { %31 = vrot.lane.b32.xlu0 %v59_v5, %s73_s24  ;;  %37 = vrot.lane.b32.xlu1 %v60_v6, %s74_s25 }
   0xe   :  { %43 = vrot.lane.b32.xlu0 %v61_v7, %s75_s0 }
  0x74   :  { %v8_v8 = vpop.permute.xlu0 %7   ;;  %v20_v9 = vpop.permute.xlu1 %19  }
  0x75   :  { %10 = vst.msk [vmem:[#allocation0] sm:$0x1] %vm9_vm1, %v8_v8  }
  0x78   :  { %v14_v10 = vpop.permute.xlu0 %13   ;;  %v26_v11 = vpop.permute.xlu1 %25  }
  0x79   :  { %16 = vst.msk [vmem:[#allocation0] sm:$0x1] %vm15_vm2, %v14_v10  }
  0x7a   :  { %22 = vst.msk [vmem:[#allocation0] sm:$0x1] %vm21_vm3, %v20_v9  }
  0x7b   :  { %28 = vst.msk [vmem:[#allocation0] sm:$0x1] %vm27_vm4, %v26_v11  }
  0x7c   :  { %v32_v12 = vpop.permute.xlu0 %31   ;;  %v38_v13 = vpop.permute.xlu1 %37  }
  0x7d   :  { %34 = vst.msk [vmem:[#allocation0] sm:$0x1] %vm33_vm5, %v32_v12  }
  0x7e   :  { %40 = vst.msk [vmem:[#allocation0] sm:$0x1] %vm39_vm6, %v38_v13  }
  0x80   :  { %v44_v14 = vpop.permute.xlu0 %43  }
  0x81   :  { %46 = vst.msk [vmem:[#allocation0] sm:$0x1] %vm45_vm7, %v44_v14  }
  0x88   :  { %v51_v15 = vld [vmem:[#allocation0] sm:$0x1] }
  0x89   :  { %54 = vst [vmem:[%s114_s1] sm:$0x1] %v51_v15 }

// kernel: lstm_forward.1
= control target key start
LH: loop header
LB: loop body
LE: loop exit
PB: predicated region body
PF: predicated region fallthrough
CT: control target
= control target key end

     0   :  { %vm55_vm0 = vcmask 1042432   ;;  %v1340_v3 = vmov 0.0   ;;  %vm30_vm1 = vcmask 23552   ;;  %s1583_s0 = inlined_call_operand.vmem [shape: f32[64,3], index: 0, kind: input, shape index: {}]   ;;  %s1584_s1 = inlined_call_operand.vmem [shape: f32[3,128], index: 1, kind: input, shape index: {}]   ;;  %s1585_s2 = inlined_call_operand.vmem [shape: f32[32,128], index: 2, kind: input, shape index: {}]   ;;  %s1586_s3 = inlined_call_operand.vmem [shape: f32[32,10], index: 3, kind: input, shape index: {}]   ;;  %s1587_s4 = inlined_call_operand.vmem [shape: f32[1,10], index: 4, kind: input, shape index: {}]   ;;  %s1588_s5 = inlined_call_operand.hbm [shape: f32[8,10], index: 5, kind: output, shape index: {}]  }
   0x1   :  { %v1379_v0 = vld [vmem:[%s1585_s2 + $0x18] sm:$0xff]  ;;  %v29_v1 = vld [vmem:[%s1584_s1] sm:$0x7]  ;;  %1145 = vmatprep.subr.mxu1 %v1340_v3  ;;  %v1391_v4 = vld [vmem:[%s1585_s2 + $0x10] sm:$0xff] }
   0x2   :  { %v21_v2 = vld [vmem:[%s1583_s0] sm:$0xff]  ;;  %1131 = vmatprep.subr.msk.mxu0 %vm55_vm0, %v29_v1  ;;  %v22_v5 = vld [vmem:[%s1583_s0 + $0x8] sm:$0xff]  ;;  %1146 = vmatpush3.msra.mxu1 %v1379_v0 }
   0x3   :  { %1132 = vmatpush3.msk.msra.mxu0 %vm55_vm0, %v29_v1 }
   0x4   :  { %10 = vsyncpa [#allocation3], 0  ;;  %1147 = vmatprep.subr.mxu1 %v1340_v3  ;;  %1133 = vmatprep.mubr.msk.f32.mxu0 %vm30_vm1, %v21_v2  ;;  %v1402_v6 = vld [vmem:[%s1585_s2 + $0x8] sm:$0xff]  ;;  %v1410_v7 = vld [vmem:[%s1585_s2] sm:$0xff]  ;;  %vm1341_vm2 = vmmov 0   ;;  %s1342_s2 = smov 32  }
   0x5   :  { %1148 = vmatpush3.msra.mxu1 %v1391_v4  ;;  %1134 = vmatmul.mubr.msk.f32.vlgmr.msra.gmra.mxu0 %vm30_vm1, %v22_v5  ;;  %s1343_s6 = smov 96   ;;  %s1344_s7 = smov 64   ;;  %vm168_vm3 = vcmask 261120   ;;  %v23_v32 = vld [vmem:[%s1583_s0 + $0x10] sm:$0xff]  ;;  %v24_v33 = vld [vmem:[%s1583_s0 + $0x18] sm:$0xff]  ;;  %v25_v34 = vld [vmem:[%s1583_s0 + $0x20] sm:$0xff] }
   0x6   :  { %1149 = vmatprep.subr.mxu1 %v1340_v3  ;;  %1153 = vmatprep.mubr.msk.f32.mxu1 %vm1341_vm2, %v1340_v3  ;;  %v26_v35 = vld [vmem:[%s1583_s0 + $0x28] sm:$0xff]  ;;  %v27_v37 = vld [vmem:[%s1583_s0 + $0x30] sm:$0xff]  ;;  %v28_v38 = vld [vmem:[%s1583_s0 + $0x38] sm:$0xff]  ;;  %vm1022_vm4 = vcmask 80896  }
   0x7   :  { %1150 = vmatpush3.msra.mxu1 %v1402_v6  ;;  %1167 = vmatprep.subr.mxu0 %v1340_v3 }
   0x8   :  { %1151 = vmatprep.subr.mxu1 %v1340_v3  ;;  %1168 = vmatpush3.msra.mxu0 %v1379_v0 }
   0x9   :  { %1152 = vmatpush3.msra.mxu1 %v1410_v7  ;;  %1169 = vmatprep.subr.mxu0 %v1340_v3 }
   0xa   :  { %1154 = vmatmul.mubr.f32.vlgmr.msra.gmra.mxu1 %v1340_v3  ;;  %1156 = vmatprep.subr.mxu1 %v1340_v3 }
   0xb   :  { %1157 = vmatpush3.msra.mxu1 %v1379_v0  ;;  %1164 = vmatprep.mubr.msk.f32.mxu1 %vm1341_vm2, %v1340_v3 }
   0xc   :  { %1158 = vmatprep.subr.mxu1 %v1340_v3  ;;  %1170 = vmatpush3.msra.mxu0 %v1391_v4 }
   0xd   :  { %1159 = vmatpush3.msra.mxu1 %v1391_v4  ;;  %1171 = vmatprep.subr.mxu0 %v1340_v3 }
   0xe   :  { %1160 = vmatprep.subr.mxu1 %v1340_v3  ;;  %1172 = vmatpush3.msra.mxu0 %v1402_v6 }
   0xf   :  { %1161 = vmatpush3.msra.mxu1 %v1402_v6  ;;  %1173 = vmatprep.subr.mxu0 %v1340_v3 }
  0x10   :  { %1162 = vmatprep.subr.mxu1 %v1340_v3  ;;  %1174 = vmatpush3.msra.mxu0 %v1410_v7 }
  0x11   :  { %1163 = vmatpush3.msra.mxu1 %v1410_v7  ;;  %1189 = vmatprep.subr.mxu0 %v1340_v3 }
  0x12   :  { %1178 = vmatprep.subr.mxu1 %v1340_v3  ;;  %1136 = vmatprep.mubr.msk.f32.mxu0 %vm30_vm1, %v23_v32 }
  0x13   :  { %1137 = vmatmul.mubr.msk.f32.gmra.mxu0 %vm30_vm1, %v24_v33 }
  0x14   :  { %1139 = vmatprep.mubr.msk.f32.mxu0 %vm30_vm1, %v25_v34 }
  0x17   :  { %1140 = vmatmul.mubr.msk.f32.gmra.mxu0 %vm30_vm1, %v26_v35 }
  0x18   :  { %1142 = vmatprep.mubr.msk.f32.mxu0 %vm30_vm1, %v27_v37 }
  0x1b   :  { %1143 = vmatmul.mubr.msk.f32.gmra.mxu0 %vm30_vm1, %v28_v38 }
  0x1c   :  { %1175 = vmatprep.mubr.msk.f32.mxu0 %vm1341_vm2, %v1340_v3 }
  0xc5   :  { %v1135_v8 = vpop.f32.mrf.mxu0 }
  0xc7   :  { %v125_v9 = vpop.f32.mrf.mxu0 }
  0xca   :  { %v238_v10 = vpop.f32.mrf.mxu1 }
  0xcb   :  { %v242_v11 = vadd.f32 %v238_v10, %v125_v9 }
  0xcc   :  { %v1155_v12 = vpop.f32.mrf.mxu1 }
  0xcd   :  { %v1060_v13 = vmul.f32 -1.442695, %v242_v11 }
  0xcf   :  { %1250 = vpow2.f32 %v1060_v13 }
  0xd3   :  { %v1138_v48 = vpop.f32.mrf.mxu0 }
  0xd5   :  { %v135_v49 = vpop.f32.mrf.mxu0 }
  0xd7   :  { %v1492_v50 = vpop.f32.mrf.mxu0 }
  0xd9   :  { %v1494_v51 = vpop.f32.mrf.mxu0 }
  0xdb   :  { %v1496_v52 = vpop.f32.mrf.mxu0 }
  0xdc   :  { %v1251_v14 = vpop.eup %1250 }
  0xdd   :  { %v247_v15 = vadd.f32 1.0, %v1251_v14  ;;  %v1498_v53 = vpop.f32.mrf.mxu0 }
  0xdf   :  { %1252 = vrcp.f32 %v247_v15 }
  0xe0   :  { %1254 = vtanh.f32 %v242_v11 }
  0xec   :  { %v1253_v16 = vpop.eup %1252 }
  0xed   :  { %262 = vrot.lane.b32.xlu1 %v1253_v16, %s1342_s2  ;;  %251 = vrot.lane.b32.xlu0 %v1253_v16, %s1343_s6  ;;  %v255_v17 = vmul.f32 0.0, %v1253_v16  ;;  %v1255_v19 = vpop.eup %1254 }
  0xf1   :  { %257 = vrot.lane.b32.xlu0 %v255_v17, %s1344_s7 }
 0x15f   :  { %v252_v18 = vpop.permute.xlu0 %251  ;;  %v263_v24 = vpop.permute.xlu1 %262 }
 0x160   :  { %v254_v20 = vmul.f32 %v1255_v19, %v252_v18 }
 0x163   :  { %v258_v21 = vpop.permute.xlu0 %257 }
 0x164   :  { %v260_v22 = vadd.f32 %v258_v21, %v254_v20 }
 0x166   :  { %1256 = vtanh.f32 %v260_v22 }
 0x173   :  { %v1257_v23 = vpop.eup %1256 }
 0x174   :  { %v265_v25 = vmul.f32 %v1257_v23, %v263_v24 }
 0x176   :  { %1165 = vmatmul.mubr.msk.f32.vlgmr.msra.gmra.mxu1 %vm168_vm3, %v265_v25 }
 0x177   :  { %1179 = vmatpush3.msra.mxu1 %v1379_v0  ;;  %1186 = vmatprep.mubr.msk.f32.mxu1 %vm1341_vm2, %v1340_v3 }
 0x178   :  { %1180 = vmatprep.subr.mxu1 %v1340_v3 }
 0x179   :  { %1181 = vmatpush3.msra.mxu1 %v1391_v4 }
 0x17a   :  { %1182 = vmatprep.subr.mxu1 %v1340_v3 }
 0x17b   :  { %1183 = vmatpush3.msra.mxu1 %v1402_v6 }
 0x17c   :  { %1184 = vmatprep.subr.mxu1 %v1340_v3 }
 0x17d   :  { %1185 = vmatpush3.msra.mxu1 %v1410_v7 }
 0x17e   :  { %1200 = vmatprep.subr.mxu1 %v1340_v3 }
 0x236   :  { %v335_v26 = vpop.f32.mrf.mxu1 }
 0x237   :  { %v339_v27 = vadd.f32 %v1135_v8, %v335_v26 }
 0x238   :  { %v1166_v28 = vpop.f32.mrf.mxu1 }
 0x239   :  { %v1062_v29 = vmul.f32 -1.442695, %v339_v27 }
 0x23b   :  { %1258 = vpow2.f32 %v1062_v29 }
 0x248   :  { %v1259_v30 = vpop.eup %1258 }
 0x249   :  { %v344_v31 = vadd.f32 1.0, %v1259_v30 }
 0x24b   :  { %1260 = vrcp.f32 %v344_v31 }
 0x24c   :  { %1262 = vtanh.f32 %v339_v27 }
 0x258   :  { %v1261_v36 = vpop.eup %1260 }
 0x259   :  { %352 = vrot.lane.b32.xlu0 %v1261_v36, %s1344_s7  ;;  %348 = vrot.lane.b32.xlu1 %v1261_v36, %s1343_s6  ;;  %v1263_v39 = vpop.eup %1262 }
 0x25d   :  { %358 = vrot.lane.b32.xlu1 %v1261_v36, %s1342_s2 }
 0x2cb   :  { %v353_v40 = vpop.permute.xlu0 %352  ;;  %v349_v41 = vpop.permute.xlu1 %348 }
 0x2cc   :  { %v355_v42 = vmul.f32 %v353_v40, %v260_v22  ;;  %v351_v43 = vmul.f32 %v1263_v39, %v349_v41 }
 0x2ce   :  { %v356_v44 = vadd.f32 %v355_v42, %v351_v43 }
 0x2cf   :  { %v359_v46 = vpop.permute.xlu1 %358 }
 0x2d0   :  { %1264 = vtanh.f32 %v356_v44 }
 0x2dd   :  { %v1265_v45 = vpop.eup %1264 }
 0x2de   :  { %v361_v47 = vmul.f32 %v1265_v45, %v359_v46 }
 0x2e0   :  { %1176 = vmatmul.mubr.msk.f32.vlgmr.msra.gmra.mxu0 %vm168_vm3, %v361_v47 }
 0x2e1   :  { %1190 = vmatpush3.msra.mxu0 %v1379_v0  ;;  %1197 = vmatprep.mubr.msk.f32.mxu0 %vm1341_vm2, %v1340_v3 }
 0x2e2   :  { %1191 = vmatprep.subr.mxu0 %v1340_v3 }
 0x2e3   :  { %1192 = vmatpush3.msra.mxu0 %v1391_v4 }
 0x2e4   :  { %1193 = vmatprep.subr.mxu0 %v1340_v3 }
 0x2e5   :  { %1194 = vmatpush3.msra.mxu0 %v1402_v6 }
 0x2e6   :  { %1195 = vmatprep.subr.mxu0 %v1340_v3 }
 0x2e7   :  { %1196 = vmatpush3.msra.mxu0 %v1410_v7 }
 0x2e8   :  { %1211 = vmatprep.subr.mxu0 %v1340_v3 }
 0x3a0   :  { %v431_v54 = vpop.f32.mrf.mxu0 }
 0x3a1   :  { %v435_v55 = vadd.f32 %v431_v54, %v135_v49 }
 0x3a2   :  { %v1177_v56 = vpop.f32.mrf.mxu0 }
 0x3a3   :  { %v1064_v57 = vmul.f32 -1.442695, %v435_v55 }
 0x3a5   :  { %1266 = vpow2.f32 %v1064_v57 }
 0x3b2   :  { %v1267_v58 = vpop.eup %1266 }
 0x3b3   :  { %v440_v59 = vadd.f32 1.0, %v1267_v58 }
 0x3b5   :  { %1268 = vrcp.f32 %v440_v59 }
 0x3b6   :  { %1270 = vtanh.f32 %v435_v55 }
 0x3c2   :  { %v1269_v60 = vpop.eup %1268 }
 0x3c3   :  { %448 = vrot.lane.b32.xlu1 %v1269_v60, %s1344_s7  ;;  %444 = vrot.lane.b32.xlu0 %v1269_v60, %s1343_s6  ;;  %v1271_v61 = vpop.eup %1270 }
 0x3c7   :  { %454 = vrot.lane.b32.xlu0 %v1269_v60, %s1342_s2 }
 0x435   :  { %v449_v62 = vpop.permute.xlu1 %448  ;;  %v445_v63 = vpop.permute.xlu0 %444 }
 0x436   :  { %v451_v1 = vmul.f32 %v449_v62, %v356_v44  ;;  %v447_v2 = vmul.f32 %v1271_v61, %v445_v63 }
 0x438   :  { %v452_v5 = vadd.f32 %v451_v1, %v447_v2 }
 0x439   :  { %v455_v9 = vpop.permute.xlu0 %454 }
 0x43a   :  { %1272 = vtanh.f32 %v452_v5 }
 0x447   :  { %v1273_v8 = vpop.eup %1272 }
 0x448   :  { %v457_v10 = vmul.f32 %v1273_v8, %v455_v9 }
 0x44a   :  { %1187 = vmatmul.mubr.msk.f32.vlgmr.msra.gmra.mxu1 %vm168_vm3, %v457_v10 }
 0x44b   :  { %1201 = vmatpush3.msra.mxu1 %v1379_v0  ;;  %1208 = vmatprep.mubr.msk.f32.mxu1 %vm1341_vm2, %v1340_v3 }
 0x44c   :  { %1202 = vmatprep.subr.mxu1 %v1340_v3 }
 0x44d   :  { %1203 = vmatpush3.msra.mxu1 %v1391_v4 }
 0x44e   :  { %1204 = vmatprep.subr.mxu1 %v1340_v3 }
 0x44f   :  { %1205 = vmatpush3.msra.mxu1 %v1402_v6 }
 0x450   :  { %1206 = vmatprep.subr.mxu1 %v1340_v3 }
 0x451   :  { %1207 = vmatpush3.msra.mxu1 %v1410_v7 }
 0x452   :  { %1222 = vmatprep.subr.mxu1 %v1340_v3 }
 0x50a   :  { %v527_v11 = vpop.f32.mrf.mxu1 }
 0x50b   :  { %v531_v12 = vadd.f32 %v1138_v48, %v527_v11 }
 0x50c   :  { %v1188_v13 = vpop.f32.mrf.mxu1 }
 0x50d   :  { %v1066_v14 = vmul.f32 -1.442695, %v531_v12 }
 0x50f   :  { %1274 = vpow2.f32 %v1066_v14 }
 0x51c   :  { %v1275_v15 = vpop.eup %1274 }
 0x51d   :  { %v536_v16 = vadd.f32 1.0, %v1275_v15 }
 0x51f   :  { %1276 = vrcp.f32 %v536_v16 }
 0x520   :  { %1278 = vtanh.f32 %v531_v12 }
 0x52c   :  { %v1277_v17 = vpop.eup %1276 }
 0x52d   :  { %544 = vrot.lane.b32.xlu0 %v1277_v17, %s1344_s7  ;;  %540 = vrot.lane.b32.xlu1 %v1277_v17, %s1343_s6  ;;  %v1279_v18 = vpop.eup %1278 }
 0x531   :  { %550 = vrot.lane.b32.xlu1 %v1277_v17, %s1342_s2 }
 0x59f   :  { %v545_v19 = vpop.permute.xlu0 %544  ;;  %v541_v20 = vpop.permute.xlu1 %540 }
 0x5a0   :  { %v547_v21 = vmul.f32 %v545_v19, %v452_v5  ;;  %v543_v22 = vmul.f32 %v1279_v18, %v541_v20  ;;  %v941_v20 = vld [vmem:[%s1586_s3 + $0x18] sm:$0xff] }
 0x5a2   :  { %v548_v23 = vadd.f32 %v547_v21, %v543_v22  ;;  %v939_v21 = vld [vmem:[%s1586_s3 + $0x8] sm:$0xff]  ;;  %v938_v22 = vld [vmem:[%s1586_s3] sm:$0xff] }
 0x5a3   :  { %v551_v25 = vpop.permute.xlu1 %550 }
 0x5a4   :  { %1280 = vtanh.f32 %v548_v23 }
 0x5b1   :  { %v1281_v24 = vpop.eup %1280 }
 0x5b2   :  { %v553_v26 = vmul.f32 %v1281_v24, %v551_v25 }
 0x5b4   :  { %1198 = vmatmul.mubr.msk.f32.vlgmr.msra.gmra.mxu0 %vm168_vm3, %v553_v26 }
 0x5b5   :  { %1212 = vmatpush3.msra.mxu0 %v1379_v0  ;;  %1219 = vmatprep.mubr.msk.f32.mxu0 %vm1341_vm2, %v1340_v3 }
 0x5b6   :  { %1213 = vmatprep.subr.mxu0 %v1340_v3 }
 0x5b7   :  { %1214 = vmatpush3.msra.mxu0 %v1391_v4 }
 0x5b8   :  { %1215 = vmatprep.subr.mxu0 %v1340_v3 }
 0x5b9   :  { %1216 = vmatpush3.msra.mxu0 %v1402_v6 }
 0x5ba   :  { %1217 = vmatprep.subr.mxu0 %v1340_v3 }
 0x5bb   :  { %1218 = vmatpush3.msra.mxu0 %v1410_v7 }
 0x5bc   :  { %1233 = vmatprep.subr.mxu0 %v1340_v3 }
 0x674   :  { %v623_v27 = vpop.f32.mrf.mxu0 }
 0x675   :  { %v627_v28 = vadd.f32 %v623_v27, %v1494_v51 }
 0x676   :  { %v1199_v29 = vpop.f32.mrf.mxu0 }
 0x677   :  { %v1068_v30 = vmul.f32 -1.442695, %v627_v28 }
 0x679   :  { %1282 = vpow2.f32 %v1068_v30 }
 0x686   :  { %v1283_v31 = vpop.eup %1282 }
 0x687   :  { %v632_v32 = vadd.f32 1.0, %v1283_v31 }
 0x689   :  { %1284 = vrcp.f32 %v632_v32  ;;  %v1075_v32 = vld [vmem:[%s1587_s4] ss:$0 sm:$0xff] }
 0x68a   :  { %1286 = vtanh.f32 %v627_v28 }
 0x696   :  { %v1285_v33 = vpop.eup %1284 }
 0x697   :  { %640 = vrot.lane.b32.xlu1 %v1285_v33, %s1344_s7  ;;  %636 = vrot.lane.b32.xlu0 %v1285_v33, %s1343_s6  ;;  %v1287_v34 = vpop.eup %1286 }
 0x69b   :  { %646 = vrot.lane.b32.xlu0 %v1285_v33, %s1342_s2 }
 0x709   :  { %v641_v35 = vpop.permute.xlu1 %640  ;;  %v637_v36 = vpop.permute.xlu0 %636 }
 0x70a   :  { %v643_v37 = vmul.f32 %v641_v35, %v548_v23  ;;  %v639_v38 = vmul.f32 %v1287_v34, %v637_v36 }
 0x70c   :  { %v644_v39 = vadd.f32 %v643_v37, %v639_v38 }
 0x70d   :  { %v647_v41 = vpop.permute.xlu0 %646 }
 0x70e   :  { %1288 = vtanh.f32 %v644_v39 }
 0x71b   :  { %v1289_v40 = vpop.eup %1288 }
 0x71c   :  { %v649_v42 = vmul.f32 %v1289_v40, %v647_v41 }
 0x71e   :  { %1209 = vmatmul.mubr.msk.f32.vlgmr.msra.gmra.mxu1 %vm168_vm3, %v649_v42 }
 0x71f   :  { %1223 = vmatpush3.msra.mxu1 %v1379_v0  ;;  %1230 = vmatprep.mubr.msk.f32.mxu1 %vm1341_vm2, %v1340_v3 }
 0x720   :  { %1224 = vmatprep.subr.mxu1 %v1340_v3 }
 0x721   :  { %1225 = vmatpush3.msra.mxu1 %v1391_v4 }
 0x722   :  { %1226 = vmatprep.subr.mxu1 %v1340_v3 }
 0x723   :  { %1227 = vmatpush3.msra.mxu1 %v1402_v6 }
 0x724   :  { %1228 = vmatprep.subr.mxu1 %v1340_v3 }
 0x725   :  { %1229 = vmatpush3.msra.mxu1 %v1410_v7 }
 0x7de   :  { %v719_v43 = vpop.f32.mrf.mxu1 }
 0x7df   :  { %v723_v44 = vadd.f32 %v1492_v50, %v719_v43 }
 0x7e0   :  { %v1210_v45 = vpop.f32.mrf.mxu1 }
 0x7e1   :  { %v1070_v0 = vmul.f32 -1.442695, %v723_v44 }
 0x7e3   :  { %1290 = vpow2.f32 %v1070_v0 }
 0x7f0   :  { %v1291_v46 = vpop.eup %1290 }
 0x7f1   :  { %v728_v47 = vadd.f32 1.0, %v1291_v46 }
 0x7f3   :  { %1292 = vrcp.f32 %v728_v47 }
 0x7f4   :  { %1294 = vtanh.f32 %v723_v44 }
 0x800   :  { %v1293_v48 = vpop.eup %1292 }
 0x801   :  { %736 = vrot.lane.b32.xlu0 %v1293_v48, %s1344_s7  ;;  %732 = vrot.lane.b32.xlu1 %v1293_v48, %s1343_s6  ;;  %v1295_v4 = vpop.eup %1294 }
 0x805   :  { %742 = vrot.lane.b32.xlu1 %v1293_v48, %s1342_s2 }
 0x873   :  { %v737_v6 = vpop.permute.xlu0 %736  ;;  %v733_v7 = vpop.permute.xlu1 %732 }
 0x874   :  { %v739_v49 = vmul.f32 %v737_v6, %v644_v39  ;;  %v735_v51 = vmul.f32 %v1295_v4, %v733_v7 }
 0x876   :  { %v740_v50 = vadd.f32 %v739_v49, %v735_v51 }
 0x877   :  { %v743_v55 = vpop.permute.xlu1 %742 }
 0x878   :  { %1296 = vtanh.f32 %v740_v50 }
 0x885   :  { %v1297_v54 = vpop.eup %1296 }
 0x886   :  { %v745_v56 = vmul.f32 %v1297_v54, %v743_v55 }
 0x888   :  { %1220 = vmatmul.mubr.msk.f32.vlgmr.msra.gmra.mxu0 %vm168_vm3, %v745_v56 }
 0x889   :  { %1241 = vmatprep.mubr.msk.f32.mxu0 %vm1341_vm2, %v1340_v3  ;;  %1234 = vmatpush3.msra.mxu0 %v941_v20 }
 0x88a   :  { %1235 = vmatprep.subr.mxu0 %v1340_v3 }
 0x948   :  { %v815_v57 = vpop.f32.mrf.mxu0 }
 0x949   :  { %v819_v58 = vadd.f32 %v815_v57, %v1498_v53 }
 0x94a   :  { %v1221_v59 = vpop.f32.mrf.mxu0 }
 0x94b   :  { %v1072_v60 = vmul.f32 -1.442695, %v819_v58 }
 0x94d   :  { %1298 = vpow2.f32 %v1072_v60 }
 0x95a   :  { %v1299_v61 = vpop.eup %1298 }
 0x95b   :  { %v824_v62 = vadd.f32 1.0, %v1299_v61 }
 0x95d   :  { %1300 = vrcp.f32 %v824_v62 }
 0x95e   :  { %1302 = vtanh.f32 %v819_v58 }
 0x96a   :  { %v1301_v63 = vpop.eup %1300 }
 0x96b   :  { %832 = vrot.lane.b32.xlu1 %v1301_v63, %s1344_s7  ;;  %828 = vrot.lane.b32.xlu0 %v1301_v63, %s1343_s6  ;;  %v1303_v1 = vpop.eup %1302 }
 0x96f   :  { %838 = vrot.lane.b32.xlu0 %v1301_v63, %s1342_s2 }
 0x9dd   :  { %v833_v2 = vpop.permute.xlu1 %832  ;;  %v829_v5 = vpop.permute.xlu0 %828 }
 0x9de   :  { %v835_v8 = vmul.f32 %v833_v2, %v740_v50  ;;  %v831_v9 = vmul.f32 %v1303_v1, %v829_v5 }
 0x9e0   :  { %v836_v53 = vadd.f32 %v835_v8, %v831_v9 }
 0x9e1   :  { %v839_v11 = vpop.permute.xlu0 %838 }
 0x9e2   :  { %1304 = vtanh.f32 %v836_v53 }
 0x9ef   :  { %v1305_v10 = vpop.eup %1304 }
 0x9f0   :  { %v841_v12 = vmul.f32 %v1305_v10, %v839_v11 }
 0x9f2   :  { %1231 = vmatmul.mubr.msk.f32.vlgmr.msra.gmra.mxu1 %vm168_vm3, %v841_v12 }
 0xab2   :  { %v911_v13 = vpop.f32.mrf.mxu1 }
 0xab3   :  { %v915_v14 = vadd.f32 %v1496_v52, %v911_v13  ;;  %v940_v52 = vld [vmem:[%s1586_s3 + $0x10] sm:$0xff]  ;;  %s1345_s3 = smov [#allocation2]  }
 0xab4   :  { %v1232_v15 = vpop.f32.mrf.mxu1  ;;  %1236 = vmatpush3.msra.mxu0 %v940_v52  ;;  %s1043_s4 = sshll.u32 %s1345_s3, 4  ;;  %s1044_s4 = int_to_ptr.vmem [resolvable:$true] %s1043_s4 }
 0xab5   :  { %v1074_v16 = vmul.f32 -1.442695, %v915_v14  ;;  %1237 = vmatprep.subr.mxu0 %v1340_v3  ;;  %s1318_s28 = scalar_lea.vmem %s1044_s4, 128  ;;  %p1323_p1 = scmp.lt.s32.totalorder %s1044_s4, %s1044_s4 }
 0xab6   :  { %1238 = vmatpush3.msra.mxu0 %v939_v21  ;;  %p1319_p0 = scmp.ne.s32.totalorder %s1044_s4, %s1318_s28  ;;  %p1324_p2 = scmp.lt.s32.totalorder %s1318_s28, %s1318_s28 }
 0xab7   :  { %1306 = vpow2.f32 %v1074_v16  ;;  %1239 = vmatprep.subr.mxu0 %v1340_v3 }
 0xab8   :  { %1240 = vmatpush3.msra.mxu0 %v938_v22  ;;  %p1325_p3 = por %p1324_p2, %p1323_p1 }
 0xaba   :  { %p1326_p4 = pnand %p1325_p3, %p1319_p0 }
 0xac4   :  { %v1307_v17 = vpop.eup %1306 }
 0xac5   :  { %v920_v18 = vadd.f32 1.0, %v1307_v17 }
 0xac7   :  { %1308 = vrcp.f32 %v920_v18 }
 0xac8   :  { %1310 = vtanh.f32 %v915_v14 }
 0xad4   :  { %v1309_v19 = vpop.eup %1308 }
 0xad5   :  { %928 = vrot.lane.b32.xlu0 %v1309_v19, %s1344_s7  ;;  %924 = vrot.lane.b32.xlu1 %v1309_v19, %s1343_s6  ;;  %v1311_v23 = vpop.eup %1310 }
 0xad9   :  { %934 = vrot.lane.b32.xlu1 %v1309_v19, %s1342_s2 }
 0xb47   :  { %v929_v24 = vpop.permute.xlu0 %928  ;;  %v925_v25 = vpop.permute.xlu1 %924 }
 0xb48   :  { %v931_v26 = vmul.f32 %v929_v24, %v836_v53  ;;  %v927_v27 = vmul.f32 %v1311_v23, %v925_v25 }
 0xb4a   :  { %v932_v28 = vadd.f32 %v931_v26, %v927_v27 }
 0xb4b   :  { %v935_v30 = vpop.permute.xlu1 %934 }
 0xb4c   :  { %1312 = vtanh.f32 %v932_v28 }
 0xb59   :  { %v1313_v29 = vpop.eup %1312 }
 0xb5a   :  { %v937_v31 = vmul.f32 %v1313_v29, %v935_v30 }
 0xb5c   :  { %1242 = vmatmul.mubr.msk.f32.vlgmr.msra.gmra.mxu0 %vm168_vm3, %v937_v31 }
 0xc1c   :  { %v1018_v33 = vpop.f32.mrf.mxu0 }
 0xc1d   :  { %v1019_v3 = vadd.f32 %v1075_v32, %v1018_v33 }
 0xc1e   :  { %v1243_v34 = vpop.f32.mrf.mxu0 }
 0xc1f   :  { %v1023_v35 = vsel %vm1022_vm4, %v1019_v3, -inf }
 0xc20   :  { %1024 = vmax.xlane.f32.xlu0 %v1023_v35 }
 0xca9   :  { %v1025_v36 = vpop.xlane.xlu0 %1024 }
 0xcaa   :  { %v1026_v37 = vsub.f32 %v1019_v3, %v1025_v36 }
 0xcac   :  { %v1027_v38 = vmul.f32 1.442695, %v1026_v37 }
 0xcae   :  { %1314 = vpow2.f32 %v1027_v38 }
 0xcbb   :  { %v1315_v39 = vpop.eup %1314 }
 0xcbc   :  { %v1029_v40 = vsel %vm1022_vm4, %v1315_v39, 0.0 }
 0xcbd   :  { %1030 = vadd.xlane.f32.xlu1 %v1029_v40 }
 0xd46   :  { %v1031_v41 = vpop.xlane.xlu1 %1030 }
 0xd47   :  { %1316 = vlog2.f32 %v1031_v41 }
 0xd54   :  { %v1317_v42 = vpop.eup %1316 }
 0xd55   :  { %v1033_v43 = vmul.f32 0.6931472, %v1317_v42 }
 0xd57   :  { %v1034_v44 = vadd.f32 %v1033_v43, %v1025_v36 }
 0xd59   :  { %v1035_v45 = vsub.f32 %v1019_v3, %v1034_v44 }
 0xd5b   :  { %1036 = vst.msk [vmem:[#allocation2] sm:$0xff] %vm1022_vm4, %v1035_v45 }
 0xd5c   :  { %1329 = shalt.err (!%p1326_p4)
}
 0xd5d   :  { %1046 = dma.vmem_to_hbm [thread:$0]  %s1044_s4, 128, %s1588_s5, [#allocation3]  }
 0xd5e   :  { %1338 = dma.done.wait [#allocation3], 128  }
 0xd5f   :  { %1339 = vsyncadd [#allocation3], 4294967168 }
 0xd60   :  { %1050 = vsyncpa [#allocation3], 1 }

</bundles_post_ra>
